<compile_context>
chip_gen: v7x
topology: tpu7x:2x2x1
jax: 0.10.0
libtpu: 0.0.40
codegen_flags: <defaults>
</compile_context>

<pallas_src>
import jax
import jax.numpy as jnp
from jax.experimental import pallas as pl
from jax.experimental.pallas import tpu as pltpu

# ---- module constants (synthetic vocab sizes; __init__ only fixes embed dims) ----
INPUT_SIZE = 390          # 10 items * (16 + 8 + 4 + 3 + 8) = 390
SEQ_LEN = 10
N_CAR, N_POI, N_REGION = 50, 20, 30
N_WEEK, N_TIME = 7, 1440
D_CAR, D_POI, D_REGION, D_WEEK, D_TIME = 16, 4, 8, 3, 8
LABEL_SIZE = 64           # synthetic number of destination clusters

# MXU/lane-friendly padded dims
PAD_K = 512               # INPUT_SIZE padded up to a multiple of 128
PAD_L = 128               # LABEL_SIZE padded up to a full lane width
H1, H2 = 256, 512
NEG_INF = -1e30


def mlp_kernel(x_ref, w1_ref, b1_ref, w2_ref, b2_ref, w3_ref, b3_ref, o_ref):
    """One batch tile: Linear->ReLU->Linear->ReLU->Linear->softmax(dim=1).

    x: (TB, 512) bf16; w*: bf16; b*: f32; o: (TB, 128) bf16 probabilities.
    Padded logit columns carry a -1e30 bias -> exp() == 0 -> zero probability.
    Elementwise tail stays f32 (v5e has no bf16 VPU/EUP path) [review #9].
    """
    x = x_ref[...]
    h1 = jnp.dot(x, w1_ref[...], preferred_element_type=jnp.float32) + b1_ref[...]
    h1 = jnp.maximum(h1, 0.0).astype(jnp.bfloat16)
    h2 = jnp.dot(h1, w2_ref[...], preferred_element_type=jnp.float32) + b2_ref[...]
    h2 = jnp.maximum(h2, 0.0).astype(jnp.bfloat16)
    logits = jnp.dot(h2, w3_ref[...], preferred_element_type=jnp.float32) + b3_ref[...]
    # numerically stable softmax over dim=1 (f32)
    m = jnp.max(logits, axis=1, keepdims=True)
    e = jnp.exp(logits - m)
    denom = jnp.sum(e, axis=1, keepdims=True)
    o_ref[...] = (e * pl.reciprocal(denom, approx=True)).astype(o_ref.dtype)


def _round_up(x, m):
    return (x + m - 1) // m * m


def _choose_batch_tile(B, max_tb):
    """Pick a batch tile [review #3/#4/#5].

    Guarantees >= 2 grid steps for B > 8 so v7x's two TensorCores both get work,
    while keeping tiles as large as possible (amortize ~0.35us/step overhead),
    capped at max_tb (512 default: v5e sweet spot; try 1024/2048 on v6e).
    """
    if B <= 8:
        return _round_up(max(B, 1), 8)
    return min(max_tb, _round_up((B + 1) // 2, 8))


def prepare_kernel_params(params_f32):
    """Pad (K: 390->512 rows of w1, N: 64->128 cols of w3/b3), cast weights to bf16.

    w1's padded rows are zero, so whatever lives in x's padded columns contributes
    nothing; b3's padded columns are -1e30 so they take zero softmax mass.
    """
    w1, b1, w2, b2, w3, b3 = params_f32
    w1p = jnp.zeros((PAD_K, H1), jnp.float32).at[:INPUT_SIZE, :].set(w1)
    w3p = jnp.zeros((H2, PAD_L), jnp.float32).at[:, :LABEL_SIZE].set(w3)
    b3p = jnp.full((1, PAD_L), NEG_INF, jnp.float32).at[:, :LABEL_SIZE].set(b3)
    return (w1p.astype(jnp.bfloat16), b1,
            w2.astype(jnp.bfloat16), b2,
            w3p.astype(jnp.bfloat16), b3p)


def mlp_forward_pallas(feat_bf16, kernel_params, *, max_tb=512):
    """feat_bf16: (B, INPUT_SIZE) bf16 -> (B, LABEL_SIZE) bf16 softmax probabilities."""
    B = feat_bf16.shape[0]
    w1, b1, w2, b2, w3, b3 = kernel_params

    TB = _choose_batch_tile(B, max_tb)
    B_pad = _round_up(B, TB)

    # Single pad op (batch rows + lane columns) applied directly to the bf16
    # gather output -> fuses into the embedding fusion; no separate f32 feat or
    # cast pass [review #2].  Padded rows are zeros and are sliced off below.
    x = jnp.pad(feat_bf16, ((0, B_pad - B), (0, PAD_K - INPUT_SIZE)))

    flops = 2 * B_pad * (PAD_K * H1 + H1 * H2 + H2 * PAD_L)
    bytes_accessed = (B_pad * PAD_K * 2 + B_pad * PAD_L * 2
                      + (PAD_K * H1 + H1 * H2 + H2 * PAD_L) * 2
                      + (H1 + H2 + PAD_L) * 4)

    out = pl.pallas_call(
        mlp_kernel,
        out_shape=jax.ShapeDtypeStruct((B_pad, PAD_L), jnp.bfloat16),  # [review #7]
        grid=(B_pad // TB,),
        in_specs=[
            pl.BlockSpec((TB, PAD_K), lambda i: (i, 0)),    # x: tiled over batch
            pl.BlockSpec((PAD_K, H1), lambda i: (0, 0)),    # weights/biases stay
            pl.BlockSpec((1, H1), lambda i: (0, 0)),        # VMEM-resident across
            pl.BlockSpec((H1, H2), lambda i: (0, 0)),       # grid steps (constant
            pl.BlockSpec((1, H2), lambda i: (0, 0)),        # index_maps -> no
            pl.BlockSpec((H2, PAD_L), lambda i: (0, 0)),    # re-fetch)
            pl.BlockSpec((1, PAD_L), lambda i: (0, 0)),
        ],
        out_specs=pl.BlockSpec((TB, PAD_L), lambda i: (i, 0)),
        compiler_params=pltpu.CompilerParams(
            dimension_semantics=("parallel",)),
        cost_estimate=pl.CostEstimate(
            flops=flops,
            transcendentals=B_pad * PAD_L,
            bytes_accessed=bytes_accessed),
    )(x, w1, b1, w2, b2, w3, b3)

    return out[:B, :LABEL_SIZE]


def embed_and_concat(x_idx, embeds):
    """Per-item concat order: car, region, poi, week, time.

    x_idx: (B, SEQ_LEN, 5) int32; embeds in bf16 -> (B, INPUT_SIZE) bf16.
    """
    car_e, poi_e, region_e, week_e, time_e = embeds
    car = jnp.take(car_e, x_idx[..., 0], axis=0)        # (B, S, 16)
    region = jnp.take(region_e, x_idx[..., 1], axis=0)  # (B, S, 8)
    poi = jnp.take(poi_e, x_idx[..., 2], axis=0)        # (B, S, 4)
    week = jnp.take(week_e, x_idx[..., 3], axis=0)      # (B, S, 3)
    time = jnp.take(time_e, x_idx[..., 4], axis=0)      # (B, S, 8)
    per_item = jnp.concatenate([car, region, poi, week, time], axis=-1)  # (B, S, 39)
    return per_item.reshape(-1, INPUT_SIZE)             # view(-1, INPUT_SIZE)


def forward(x_idx, embeds_bf16, kernel_params):
    """Full forward: gather (XLA, bf16) -> pad (fused) -> Pallas MLP+softmax."""
    feat = embed_and_concat(x_idx, embeds_bf16)          # (B, 390) bf16
    return mlp_forward_pallas(feat, kernel_params)       # (B, LABEL_SIZE) bf16


forward_jit = jax.jit(forward)


def make_params(key):
    ks = jax.random.split(key, 11)
    scale = 0.05
    car_e = jax.random.normal(ks[0], (N_CAR, D_CAR), jnp.float32) * scale
    poi_e = jax.random.normal(ks[1], (N_POI, D_POI), jnp.float32) * scale
    region_e = jax.random.normal(ks[2], (N_REGION, D_REGION), jnp.float32) * scale
    week_e = jax.random.normal(ks[3], (N_WEEK, D_WEEK), jnp.float32) * scale
    time_e = jax.random.normal(ks[4], (N_TIME, D_TIME), jnp.float32) * scale
    w1 = jax.random.normal(ks[5], (INPUT_SIZE, H1), jnp.float32) * scale
    b1 = jax.random.normal(ks[6], (1, H1), jnp.float32) * scale
    w2 = jax.random.normal(ks[7], (H1, H2), jnp.float32) * scale
    b2 = jax.random.normal(ks[8], (1, H2), jnp.float32) * scale
    w3 = jax.random.normal(ks[9], (H2, LABEL_SIZE), jnp.float32) * scale
    b3 = jax.random.normal(ks[10], (1, LABEL_SIZE), jnp.float32) * scale
    embeds = (car_e, poi_e, region_e, week_e, time_e)
    mlp_params = (w1, b1, w2, b2, w3, b3)
    return embeds, mlp_params


def reference_forward(feat_f32, params):
    w1, b1, w2, b2, w3, b3 = params
    h1 = jnp.maximum(feat_f32 @ w1 + b1, 0.0)
    h2 = jnp.maximum(h1 @ w2 + b2, 0.0)
    logits = h2 @ w3 + b3
    return jax.nn.softmax(logits, axis=1)


if __name__ == "__main__":
    key = jax.random.PRNGKey(0)
    k_param, k_c, k_r, k_p, k_w, k_t = jax.random.split(key, 6)
    embeds_f32, mlp_params = make_params(k_param)
    embeds_bf16 = tuple(e.astype(jnp.bfloat16) for e in embeds_f32)  # [review #2]
    kernel_params = prepare_kernel_params(mlp_params)

    B = 2
    # integer feature indices: (B, SEQ_LEN, 5) = [car, region, poi, week, time]
    car_idx = jax.random.randint(k_c, (B, SEQ_LEN, 1), 0, N_CAR)
    region_idx = jax.random.randint(k_r, (B, SEQ_LEN, 1), 0, N_REGION)
    poi_idx = jax.random.randint(k_p, (B, SEQ_LEN, 1), 0, N_POI)
    week_idx = jax.random.randint(k_w, (B, SEQ_LEN, 1), 0, N_WEEK)
    time_idx = jax.random.randint(k_t, (B, SEQ_LEN, 1), 0, N_TIME)
    x_idx = jnp.concatenate([car_idx, region_idx, poi_idx, week_idx, time_idx],
                            axis=-1).astype(jnp.int32)

    out = forward_jit(x_idx, embeds_bf16, kernel_params)  # (B, LABEL_SIZE) bf16
    out = jax.block_until_ready(out)

    # f32 reference built from the SAME bf16 features (isolates kernel error:
    # bf16 MXU operands, bf16 writeback, approx reciprocal -> looser tolerance).
    feat_bf16 = embed_and_concat(x_idx, embeds_bf16)
    ref = reference_forward(feat_bf16.astype(jnp.float32), mlp_params)
    out_f32 = out.astype(jnp.float32)

    assert out.shape == (B, LABEL_SIZE)
    assert jnp.allclose(out_f32, ref, atol=2e-2, rtol=5e-2), (
        f"max abs err {jnp.max(jnp.abs(out_f32 - ref))}")
    assert jnp.allclose(jnp.sum(out_f32, axis=1), 1.0, atol=2e-2)

    print("KERNEL_OK")
</pallas_src>

<mosaic_0001>
module attributes {stable_mosaic.version = 11 : i64} {
  func.func @mlp_kernel(%arg0: i32, %arg1: memref<8x512xbf16, #tpu.memory_space<vmem>>, %arg2: memref<512x256xbf16, #tpu.memory_space<vmem>>, %arg3: memref<1x256xf32, #tpu.memory_space<vmem>>, %arg4: memref<256x512xbf16, #tpu.memory_space<vmem>>, %arg5: memref<1x512xf32, #tpu.memory_space<vmem>>, %arg6: memref<512x128xbf16, #tpu.memory_space<vmem>>, %arg7: memref<1x128xf32, #tpu.memory_space<vmem>>, %arg8: memref<8x128xbf16, #tpu.memory_space<vmem>>) attributes {dimension_semantics = [#tpu.dimension_semantics<parallel>], iteration_bounds = array<i64: 1>, scalar_prefetch = 0 : i64, scratch_operands = 0 : i64, tpu.core_type = #tpu.core_type<tc>, window_params = [{transform_indices = @transform_0, window_bounds = array<i64: 8, 512>}, {pipeline_mode = #tpu.pipeline_mode<synchronous>, transform_indices = @transform_1, window_bounds = array<i64: 512, 256>}, {pipeline_mode = #tpu.pipeline_mode<synchronous>, transform_indices = @transform_2, window_bounds = array<i64: 1, 256>}, {pipeline_mode = #tpu.pipeline_mode<synchronous>, transform_indices = @transform_3, window_bounds = array<i64: 256, 512>}, {pipeline_mode = #tpu.pipeline_mode<synchronous>, transform_indices = @transform_4, window_bounds = array<i64: 1, 512>}, {pipeline_mode = #tpu.pipeline_mode<synchronous>, transform_indices = @transform_5, window_bounds = array<i64: 512, 128>}, {pipeline_mode = #tpu.pipeline_mode<synchronous>, transform_indices = @transform_6, window_bounds = array<i64: 1, 128>}, {transform_indices = @transform_7, window_bounds = array<i64: 8, 128>}]} {
    %c0 = arith.constant 0 : index
    %c0_0 = arith.constant 0 : index
    %0 = vector.load %arg1[%c0, %c0_0] : memref<8x512xbf16, #tpu.memory_space<vmem>>, vector<8x512xbf16>
    %c0_1 = arith.constant 0 : index
    %c0_2 = arith.constant 0 : index
    %1 = vector.load %arg2[%c0_1, %c0_2] : memref<512x256xbf16, #tpu.memory_space<vmem>>, vector<512x256xbf16>
    %cst = arith.constant dense<0.000000e+00> : vector<8x256xf32>
    %2 = tpu.matmul %0, %1, %cst {dimension_numbers = #tpu.dot_dimension_numbers<[1], [0], [0], [1], [0, 0, 1, 1], [], []>} : vector<8x512xbf16>, vector<512x256xbf16>, vector<8x256xf32> -> vector<8x256xf32>
    %c0_3 = arith.constant 0 : index
    %c0_4 = arith.constant 0 : index
    %3 = vector.load %arg3[%c0_3, %c0_4] : memref<1x256xf32, #tpu.memory_space<vmem>>, vector<1x256xf32>
    %4 = vector.broadcast %3 : vector<1x256xf32> to vector<8x256xf32>
    %5 = arith.addf %2, %4 : vector<8x256xf32>
    %cst_5 = arith.constant 0.000000e+00 : f32
    %6 = vector.broadcast %cst_5 : f32 to vector<8x256xf32>
    %7 = arith.maximumf %5, %6 : vector<8x256xf32>
    %8 = arith.truncf %7 : vector<8x256xf32> to vector<8x256xbf16>
    %c0_6 = arith.constant 0 : index
    %c0_7 = arith.constant 0 : index
    %9 = vector.load %arg4[%c0_6, %c0_7] : memref<256x512xbf16, #tpu.memory_space<vmem>>, vector<256x512xbf16>
    %cst_8 = arith.constant dense<0.000000e+00> : vector<8x512xf32>
    %10 = tpu.matmul %8, %9, %cst_8 {dimension_numbers = #tpu.dot_dimension_numbers<[1], [0], [0], [1], [0, 0, 1, 1], [], []>} : vector<8x256xbf16>, vector<256x512xbf16>, vector<8x512xf32> -> vector<8x512xf32>
    %c0_9 = arith.constant 0 : index
    %c0_10 = arith.constant 0 : index
    %11 = vector.load %arg5[%c0_9, %c0_10] : memref<1x512xf32, #tpu.memory_space<vmem>>, vector<1x512xf32>
    %12 = vector.broadcast %11 : vector<1x512xf32> to vector<8x512xf32>
    %13 = arith.addf %10, %12 : vector<8x512xf32>
    %cst_11 = arith.constant 0.000000e+00 : f32
    %14 = vector.broadcast %cst_11 : f32 to vector<8x512xf32>
    %15 = arith.maximumf %13, %14 : vector<8x512xf32>
    %16 = arith.truncf %15 : vector<8x512xf32> to vector<8x512xbf16>
    %c0_12 = arith.constant 0 : index
    %c0_13 = arith.constant 0 : index
    %17 = vector.load %arg6[%c0_12, %c0_13] : memref<512x128xbf16, #tpu.memory_space<vmem>>, vector<512x128xbf16>
    %cst_14 = arith.constant dense<0.000000e+00> : vector<8x128xf32>
    %18 = tpu.matmul %16, %17, %cst_14 {dimension_numbers = #tpu.dot_dimension_numbers<[1], [0], [0], [1], [0, 0, 1, 1], [], []>} : vector<8x512xbf16>, vector<512x128xbf16>, vector<8x128xf32> -> vector<8x128xf32>
    %c0_15 = arith.constant 0 : index
    %c0_16 = arith.constant 0 : index
    %19 = vector.load %arg7[%c0_15, %c0_16] : memref<1x128xf32, #tpu.memory_space<vmem>>, vector<1x128xf32>
    %20 = vector.broadcast %19 : vector<1x128xf32> to vector<8x128xf32>
    %21 = arith.addf %18, %20 : vector<8x128xf32>
    %cst_17 = arith.constant dense<0xFF800000> : vector<8xf32>
    %22 = vector.multi_reduction <maximumf>, %21, %cst_17 [1] : vector<8x128xf32> to vector<8xf32>
    %23 = vector.shape_cast %22 : vector<8xf32> to vector<8x1xf32>
    %24 = vector.broadcast %23 : vector<8x1xf32> to vector<8x128xf32>
    %25 = arith.subf %21, %24 : vector<8x128xf32>
    %26 = math.exp %25 : vector<8x128xf32>
    %cst_18 = arith.constant dense<0.000000e+00> : vector<8xf32>
    %27 = vector.multi_reduction <add>, %26, %cst_18 [1] : vector<8x128xf32> to vector<8xf32>
    %28 = vector.shape_cast %27 : vector<8xf32> to vector<8x1xf32>
    %29 = tpu.reciprocal %28 {approx = true} : vector<8x1xf32> -> vector<8x1xf32>
    %30 = vector.broadcast %29 : vector<8x1xf32> to vector<8x128xf32>
    %31 = arith.mulf %26, %30 : vector<8x128xf32>
    %32 = arith.truncf %31 : vector<8x128xf32> to vector<8x128xbf16>
    %c0_19 = arith.constant 0 : index
    %c0_20 = arith.constant 0 : index
    %33 = vector.load %arg8[%c0_19, %c0_20] : memref<8x128xbf16, #tpu.memory_space<vmem>>, vector<8x128xbf16>
    tpu.vector_store %arg8[%c0_19, %c0_20], %32 {strides = array<i32>} : memref<8x128xbf16, #tpu.memory_space<vmem>>, vector<8x128xbf16>,
    return
  }
  func.func @transform_0(%arg0: i32) -> (i32, i32) {
    %c0_i32 = arith.constant 0 : i32
    %c0_i32_0 = arith.constant 0 : i32
    return %arg0, %c0_i32 : i32, i32
  }
  func.func @transform_1(%arg0: i32) -> (i32, i32) {
    %c0_i32 = arith.constant 0 : i32
    %c0_i32_0 = arith.constant 0 : i32
    %c0_i32_1 = arith.constant 0 : i32
    return %c0_i32, %c0_i32_0 : i32, i32
  }
  func.func @transform_2(%arg0: i32) -> (i32, i32) {
    %c0_i32 = arith.constant 0 : i32
    %c0_i32_0 = arith.constant 0 : i32
    %c0_i32_1 = arith.constant 0 : i32
    return %c0_i32, %c0_i32_0 : i32, i32
  }
  func.func @transform_3(%arg0: i32) -> (i32, i32) {
    %c0_i32 = arith.constant 0 : i32
    %c0_i32_0 = arith.constant 0 : i32
    %c0_i32_1 = arith.constant 0 : i32
    return %c0_i32, %c0_i32_0 : i32, i32
  }
  func.func @transform_4(%arg0: i32) -> (i32, i32) {
    %c0_i32 = arith.constant 0 : i32
    %c0_i32_0 = arith.constant 0 : i32
    %c0_i32_1 = arith.constant 0 : i32
    return %c0_i32, %c0_i32_0 : i32, i32
  }
  func.func @transform_5(%arg0: i32) -> (i32, i32) {
    %c0_i32 = arith.constant 0 : i32
    %c0_i32_0 = arith.constant 0 : i32
    %c0_i32_1 = arith.constant 0 : i32
    return %c0_i32, %c0_i32_0 : i32, i32
  }
  func.func @transform_6(%arg0: i32) -> (i32, i32) {
    %c0_i32 = arith.constant 0 : i32
    %c0_i32_0 = arith.constant 0 : i32
    %c0_i32_1 = arith.constant 0 : i32
    return %c0_i32, %c0_i32_0 : i32, i32
  }
  func.func @transform_7(%arg0: i32) -> (i32, i32) {
    %c0_i32 = arith.constant 0 : i32
    %c0_i32_0 = arith.constant 0 : i32
    return %arg0, %c0_i32 : i32, i32
  }
}

</mosaic_0001>

<bundles_post_ra>
// kernel: forward.1
= control target key start
LH: loop header
LB: loop body
LE: loop exit
PB: predicated region body
PF: predicated region fallthrough
CT: control target
= control target key end

     0   :  { %s2394_s1 = inlined_call_operand.vmem [shape: bf16[512,256], index: 1, kind: input, shape index: {}]   ;;  %s2395_s0 = inlined_call_operand.vmem [shape: bf16[8,512], index: 0, kind: input, shape index: {}]   ;;  %s2396_s3 = inlined_call_operand.vmem [shape: bf16[256,512], index: 3, kind: input, shape index: {}]   ;;  %s2397_s5 = inlined_call_operand.vmem [shape: bf16[512,128], index: 5, kind: input, shape index: {}]   ;;  %s2398_s2 = inlined_call_operand.vmem [shape: f32[1,256], index: 2, kind: input, shape index: {}]   ;;  %s2399_s4 = inlined_call_operand.vmem [shape: f32[1,512], index: 4, kind: input, shape index: {}]   ;;  %s2400_s6 = inlined_call_operand.vmem [shape: f32[1,128], index: 6, kind: input, shape index: {}]   ;;  %s2401_s7 = inlined_call_operand.vmem [shape: bf16[8,128], index: 7, kind: output, shape index: {}]  }
   0x1   :  { %v1594_v0 = vld [vmem:[%s2394_s1 + $0x4] ss:$8 sps:$4 sm:$0xff]   ;;  %v1596_v1 = vld [vmem:[%s2394_s1] ss:$8 sps:$4 sm:$0xff]   ;;  %v1597_v2 = vld [vmem:[%s2394_s1 + $0x14] ss:$8 sps:$4 sm:$0xff]  }
   0x2   :  { %439 = vmatprep.subr.bf16.mxu0 %v1594_v0  ;;  %v1599_v3 = vld [vmem:[%s2394_s1 + $0x10] ss:$8 sps:$4 sm:$0xff]   ;;  %v1600_v4 = vld [vmem:[%s2394_s1 + $0x24] ss:$8 sps:$4 sm:$0xff]   ;;  %v1602_v5 = vld [vmem:[%s2394_s1 + $0x20] ss:$8 sps:$4 sm:$0xff]  }
   0x3   :  { %440 = vmatpush1.bf16.msra.mxu0 %v1596_v1  ;;  %v1603_v6 = vld [vmem:[%s2394_s1 + $0x34] ss:$8 sps:$4 sm:$0xff]   ;;  %v1605_v7 = vld [vmem:[%s2394_s1 + $0x30] ss:$8 sps:$4 sm:$0xff]   ;;  %v1606_v8 = vld [vmem:[%s2394_s1 + $0x44] ss:$8 sps:$4 sm:$0xff]  }
   0x4   :  { %441 = vmatprep.subr.bf16.mxu0 %v1597_v2  ;;  %v1608_v9 = vld [vmem:[%s2394_s1 + $0x40] ss:$8 sps:$4 sm:$0xff]   ;;  %v1609_v10 = vld [vmem:[%s2394_s1 + $0x54] ss:$8 sps:$4 sm:$0xff]   ;;  %v1611_v11 = vld [vmem:[%s2394_s1 + $0x50] ss:$8 sps:$4 sm:$0xff]  }
   0x5   :  { %v1612_v12 = vld [vmem:[%s2394_s1 + $0x64] ss:$8 sps:$4 sm:$0xff]   ;;  %v1614_v15 = vld [vmem:[%s2394_s1 + $0x60] ss:$8 sps:$4 sm:$0xff]   ;;  %v1615_v16 = vld [vmem:[%s2394_s1 + $0x74] ss:$8 sps:$4 sm:$0xff]  }
   0x6   :  { %v1908_v13 = vld [vmem:[%s2395_s0] sm:$0xff]  ;;  %v1617_v17 = vld [vmem:[%s2394_s1 + $0x70] ss:$8 sps:$4 sm:$0xff]   ;;  %v1621_v20 = vld [vmem:[%s2394_s1 + $0x94] ss:$8 sps:$4 sm:$0xff]  }
   0x7   :  { %442 = vmatpush1.bf16.msra.mxu0 %v1599_v3  ;;  %v1380_v14 = vcombine.high %v1908_v13, %v1908_v13  ;;  %v1618_v18 = vld [vmem:[%s2394_s1 + $0x84] ss:$8 sps:$4 sm:$0xff]   ;;  %v1620_v19 = vld [vmem:[%s2394_s1 + $0x80] ss:$8 sps:$4 sm:$0xff]   ;;  %v1623_v21 = vld [vmem:[%s2394_s1 + $0x90] ss:$8 sps:$4 sm:$0xff]   ;;  %v1379_v48 = vcombine.low %v1908_v13, %v1908_v13 }
   0x8   :  { %443 = vmatprep.subr.bf16.mxu0 %v1600_v4  ;;  %v1624_v22 = vld [vmem:[%s2394_s1 + $0xa4] ss:$8 sps:$4 sm:$0xff]   ;;  %v1626_v23 = vld [vmem:[%s2394_s1 + $0xa0] ss:$8 sps:$4 sm:$0xff]   ;;  %v1627_v24 = vld [vmem:[%s2394_s1 + $0xb4] ss:$8 sps:$4 sm:$0xff]  }
   0x9   :  { %471 = vmatprep.mubr.bf16.mxu0 %v1380_v14  ;;  %v1629_v25 = vld [vmem:[%s2394_s1 + $0xb0] ss:$8 sps:$4 sm:$0xff]   ;;  %v1630_v26 = vld [vmem:[%s2394_s1 + $0xc4] ss:$8 sps:$4 sm:$0xff]   ;;  %v1632_v30 = vld [vmem:[%s2394_s1 + $0xc0] ss:$8 sps:$4 sm:$0xff]  }
   0xa   :  { %v1694_v27 = vld [vmem:[%s2396_s3 + $0x4] ss:$16 sps:$4 sm:$0xff]   ;;  %v1696_v28 = vld [vmem:[%s2396_s3] ss:$16 sps:$4 sm:$0xff]   ;;  %v1999_v43 = vld [vmem:[%s2395_s0 + $0x8] sm:$0xff] }
   0xb   :  { %444 = vmatpush1.bf16.msra.mxu0 %v1602_v5  ;;  %v1697_v29 = vld [vmem:[%s2396_s3 + $0x24] ss:$16 sps:$4 sm:$0xff]   ;;  %931 = vmatprep.subr.bf16.mxu1 %v1694_v27  ;;  %v1699_v31 = vld [vmem:[%s2396_s3 + $0x20] ss:$16 sps:$4 sm:$0xff]   ;;  %v1382_v51 = vcombine.high %v1999_v43, %v1999_v43 }
   0xc   :  { %445 = vmatprep.subr.bf16.mxu0 %v1603_v6  ;;  %932 = vmatpush1.bf16.msra.mxu1 %v1696_v28  ;;  %v1633_v32 = vld [vmem:[%s2394_s1 + $0xd4] ss:$8 sps:$4 sm:$0xff]   ;;  %v1635_v34 = vld [vmem:[%s2394_s1 + $0xd0] ss:$8 sps:$4 sm:$0xff]   ;;  %v1636_v36 = vld [vmem:[%s2394_s1 + $0xe4] ss:$8 sps:$4 sm:$0xff]  }
   0xd   :  { %933 = vmatprep.subr.bf16.mxu1 %v1697_v29  ;;  %v1700_v33 = vld [vmem:[%s2396_s3 + $0x44] ss:$16 sps:$4 sm:$0xff]   ;;  %v1702_v35 = vld [vmem:[%s2396_s3 + $0x40] ss:$16 sps:$4 sm:$0xff]  }
   0xe   :  { %v1703_v37 = vld [vmem:[%s2396_s3 + $0x64] ss:$16 sps:$4 sm:$0xff]   ;;  %v1638_v38 = vld [vmem:[%s2394_s1 + $0xe0] ss:$8 sps:$4 sm:$0xff]   ;;  %v1641_v42 = vld [vmem:[%s2394_s1 + $0xf0] ss:$8 sps:$4 sm:$0xff]  }
   0xf   :  { %446 = vmatpush1.bf16.msra.mxu0 %v1605_v7  ;;  %v1705_v39 = vld [vmem:[%s2396_s3 + $0x60] ss:$16 sps:$4 sm:$0xff]   ;;  %v1639_v40 = vld [vmem:[%s2394_s1 + $0xf4] ss:$8 sps:$4 sm:$0xff]   ;;  %v1647_v45 = vld [vmem:[%s2394_s1 + $0x104] ss:$8 sps:$4 sm:$0xff]  }
  0x10   :  { %447 = vmatprep.subr.bf16.mxu0 %v1606_v8  ;;  %934 = vmatpush1.bf16.msra.mxu1 %v1699_v31  ;;  %v1706_v41 = vld [vmem:[%s2396_s3 + $0x84] ss:$16 sps:$4 sm:$0xff]   ;;  %v1708_v44 = vld [vmem:[%s2396_s3 + $0x80] ss:$16 sps:$4 sm:$0xff]  }
  0x11   :  { %935 = vmatprep.subr.bf16.mxu1 %v1700_v33  ;;  %v1709_v46 = vld [vmem:[%s2396_s3 + $0xa4] ss:$16 sps:$4 sm:$0xff]   ;;  %v1645_v47 = vld [vmem:[%s2394_s1 + $0x100] ss:$8 sps:$4 sm:$0xff]   ;;  %v1648_v53 = vld [vmem:[%s2394_s1 + $0x110] ss:$8 sps:$4 sm:$0xff]   ;;  %v1381_v33 = vcombine.low %v1999_v43, %v1999_v43 }
  0x12   :  { %v1650_v49 = vld [vmem:[%s2394_s1 + $0x114] ss:$8 sps:$4 sm:$0xff]   ;;  %v1711_v50 = vld [vmem:[%s2396_s3 + $0xa0] ss:$16 sps:$4 sm:$0xff]   ;;  %v1653_v54 = vld [vmem:[%s2394_s1 + $0x124] ss:$8 sps:$4 sm:$0xff]  }
  0x13   :  { %448 = vmatpush1.bf16.msra.mxu0 %v1608_v9  ;;  %v1712_v52 = vld [vmem:[%s2396_s3 + $0xc4] ss:$16 sps:$4 sm:$0xff]   ;;  %v1714_v55 = vld [vmem:[%s2396_s3 + $0xc0] ss:$16 sps:$4 sm:$0xff]  }
  0x14   :  { %449 = vmatprep.subr.bf16.mxu0 %v1609_v10  ;;  %936 = vmatpush1.bf16.msra.mxu1 %v1702_v35  ;;  %v1715_v56 = vld [vmem:[%s2396_s3 + $0xe4] ss:$16 sps:$4 sm:$0xff]   ;;  %v1651_v57 = vld [vmem:[%s2394_s1 + $0x120] ss:$8 sps:$4 sm:$0xff]   ;;  %v1654_v61 = vld [vmem:[%s2394_s1 + $0x130] ss:$8 sps:$4 sm:$0xff]  }
  0x15   :  { %937 = vmatprep.subr.bf16.mxu1 %v1703_v37  ;;  %v1656_v58 = vld [vmem:[%s2394_s1 + $0x134] ss:$8 sps:$4 sm:$0xff]   ;;  %v1717_v59 = vld [vmem:[%s2396_s3 + $0xe0] ss:$16 sps:$4 sm:$0xff]   ;;  %v1659_v62 = vld [vmem:[%s2394_s1 + $0x144] ss:$8 sps:$4 sm:$0xff]  }
  0x16   :  { %v1718_v60 = vld [vmem:[%s2396_s3 + $0x104] ss:$16 sps:$4 sm:$0xff]   ;;  %v1720_v63 = vld [vmem:[%s2396_s3 + $0x100] ss:$16 sps:$4 sm:$0xff]  }
  0x17   :  { %450 = vmatpush1.bf16.msra.mxu0 %v1611_v11  ;;  %v1721_v0 = vld [vmem:[%s2396_s3 + $0x124] ss:$16 sps:$4 sm:$0xff]   ;;  %v1657_v1 = vld [vmem:[%s2394_s1 + $0x140] ss:$8 sps:$4 sm:$0xff]   ;;  %v1660_v5 = vld [vmem:[%s2394_s1 + $0x150] ss:$8 sps:$4 sm:$0xff]  }
  0x18   :  { %451 = vmatprep.subr.bf16.mxu0 %v1612_v12  ;;  %938 = vmatpush1.bf16.msra.mxu1 %v1705_v39  ;;  %v1662_v2 = vld [vmem:[%s2394_s1 + $0x154] ss:$8 sps:$4 sm:$0xff]   ;;  %v1723_v3 = vld [vmem:[%s2396_s3 + $0x120] ss:$16 sps:$4 sm:$0xff]   ;;  %v1665_v6 = vld [vmem:[%s2394_s1 + $0x164] ss:$8 sps:$4 sm:$0xff]  }
  0x19   :  { %939 = vmatprep.subr.bf16.mxu1 %v1706_v41  ;;  %v1724_v4 = vld [vmem:[%s2396_s3 + $0x144] ss:$16 sps:$4 sm:$0xff]   ;;  %v1726_v7 = vld [vmem:[%s2396_s3 + $0x140] ss:$16 sps:$4 sm:$0xff]   ;;  %v1792_v41 = vld [vmem:[%s2397_s5 + $0x48] sm:$0xff]  }
  0x1a   :  { %v1727_v8 = vld [vmem:[%s2396_s3 + $0x164] ss:$16 sps:$4 sm:$0xff]   ;;  %v1663_v9 = vld [vmem:[%s2394_s1 + $0x160] ss:$8 sps:$4 sm:$0xff]   ;;  %v1666_v13 = vld [vmem:[%s2394_s1 + $0x170] ss:$8 sps:$4 sm:$0xff]  }
  0x1b   :  { %452 = vmatpush1.bf16.msra.mxu0 %v1614_v15  ;;  %v1668_v10 = vld [vmem:[%s2394_s1 + $0x174] ss:$8 sps:$4 sm:$0xff]   ;;  %v1729_v11 = vld [vmem:[%s2396_s3 + $0x160] ss:$16 sps:$4 sm:$0xff]   ;;  %v1671_v14 = vld [vmem:[%s2394_s1 + $0x184] ss:$8 sps:$4 sm:$0xff]  }
  0x1c   :  { %453 = vmatprep.subr.bf16.mxu0 %v1615_v16  ;;  %940 = vmatpush1.bf16.msra.mxu1 %v1708_v44  ;;  %v1730_v12 = vld [vmem:[%s2396_s3 + $0x184] ss:$16 sps:$4 sm:$0xff]   ;;  %v1732_v15 = vld [vmem:[%s2396_s3 + $0x180] ss:$16 sps:$4 sm:$0xff]  }
  0x1d   :  { %941 = vmatprep.subr.bf16.mxu1 %v1709_v46  ;;  %v1733_v16 = vld [vmem:[%s2396_s3 + $0x1a4] ss:$16 sps:$4 sm:$0xff]   ;;  %v1684_v28 = vld [vmem:[%s2394_s1 + $0x1d0] ss:$8 sps:$4 sm:$0xff]  }
  0x1e   :  { %v1686_v27 = vld [vmem:[%s2394_s1 + $0x1d4] ss:$8 sps:$4 sm:$0xff]   ;;  %v1689_v29 = vld [vmem:[%s2394_s1 + $0x1e4] ss:$8 sps:$4 sm:$0xff]   ;;  %v1738_v35 = vld [vmem:[%s2396_s3 + $0x1c0] ss:$16 sps:$4 sm:$0xff]  }
  0x1f   :  { %454 = vmatpush1.bf16.msra.mxu0 %v1617_v17  ;;  %v1669_v17 = vld [vmem:[%s2394_s1 + $0x180] ss:$8 sps:$4 sm:$0xff]   ;;  %v1692_v31 = vld [vmem:[%s2394_s1 + $0x1f4] ss:$8 sps:$4 sm:$0xff]  }
  0x20   :  { %455 = vmatprep.subr.bf16.mxu0 %v1618_v18  ;;  %942 = vmatpush1.bf16.msra.mxu1 %v1711_v50  ;;  %v1674_v18 = vld [vmem:[%s2394_s1 + $0x194] ss:$8 sps:$4 sm:$0xff]   ;;  %v1741_v37 = vld [vmem:[%s2396_s3 + $0x1e0] ss:$16 sps:$4 sm:$0xff]   ;;  %v1801_v50 = vld [vmem:[%s2397_s5 + $0x28] sm:$0xff]  }
  0x21   :  { %943 = vmatprep.subr.bf16.mxu1 %v1712_v52  ;;  %v1790_v39 = vld [vmem:[%s2397_s5 + $0x40] sm:$0xff]   ;;  %v1794_v43 = vld [vmem:[%s2397_s5 + $0x50] sm:$0xff]   ;;  %v1797_v46 = vld [vmem:[%s2397_s5 + $0x18] sm:$0xff]  }
  0x22   :  { %v1795_v44 = vld [vmem:[%s2397_s5 + $0x10] sm:$0xff]  }
  0x23   :  { %456 = vmatpush1.bf16.msra.mxu0 %v1620_v19  ;;  %v1735_v19 = vld [vmem:[%s2396_s3 + $0x1a0] ss:$16 sps:$4 sm:$0xff]  }
  0x24   :  { %457 = vmatprep.subr.bf16.mxu0 %v1621_v20  ;;  %944 = vmatpush1.bf16.msra.mxu1 %v1714_v55  ;;  %v1672_v20 = vld [vmem:[%s2394_s1 + $0x190] ss:$8 sps:$4 sm:$0xff]  }
  0x25   :  { %945 = vmatprep.subr.bf16.mxu1 %v1715_v56 }
  0x27   :  { %458 = vmatpush1.bf16.msra.mxu0 %v1623_v21  ;;  %v1677_v21 = vld [vmem:[%s2394_s1 + $0x1a4] ss:$8 sps:$4 sm:$0xff]  }
  0x28   :  { %459 = vmatprep.subr.bf16.mxu0 %v1624_v22  ;;  %946 = vmatpush1.bf16.msra.mxu1 %v1717_v59  ;;  %v1675_v22 = vld [vmem:[%s2394_s1 + $0x1a0] ss:$8 sps:$4 sm:$0xff]  }
  0x29   :  { %947 = vmatprep.subr.bf16.mxu1 %v1718_v60 }
  0x2b   :  { %460 = vmatpush1.bf16.msra.mxu0 %v1626_v23  ;;  %v1680_v23 = vld [vmem:[%s2394_s1 + $0x1b4] ss:$8 sps:$4 sm:$0xff]  }
  0x2c   :  { %461 = vmatprep.subr.bf16.mxu0 %v1627_v24  ;;  %948 = vmatpush1.bf16.msra.mxu1 %v1720_v63  ;;  %v1678_v24 = vld [vmem:[%s2394_s1 + $0x1b0] ss:$8 sps:$4 sm:$0xff]  }
  0x2d   :  { %949 = vmatprep.subr.bf16.mxu1 %v1721_v0 }
  0x2f   :  { %462 = vmatpush1.bf16.msra.mxu0 %v1629_v25  ;;  %v1683_v25 = vld [vmem:[%s2394_s1 + $0x1c4] ss:$8 sps:$4 sm:$0xff]  }
  0x30   :  { %463 = vmatprep.subr.bf16.mxu0 %v1630_v26  ;;  %950 = vmatpush1.bf16.msra.mxu1 %v1723_v3  ;;  %v1681_v26 = vld [vmem:[%s2394_s1 + $0x1c0] ss:$8 sps:$4 sm:$0xff]  }
  0x31   :  { %951 = vmatprep.subr.bf16.mxu1 %v1724_v4  ;;  %v1742_v3 = vld [vmem:[%s2396_s3 + $0x8] ss:$16 sps:$4 sm:$0xff]  }
  0x33   :  { %464 = vmatpush1.bf16.msra.mxu0 %v1632_v30  ;;  %v1687_v30 = vld [vmem:[%s2394_s1 + $0x1e0] ss:$8 sps:$4 sm:$0xff]  }
  0x34   :  { %465 = vmatprep.subr.bf16.mxu0 %v1633_v32  ;;  %952 = vmatpush1.bf16.msra.mxu1 %v1726_v7  ;;  %v1690_v32 = vld [vmem:[%s2394_s1 + $0x1f0] ss:$8 sps:$4 sm:$0xff]   ;;  %v1750_v7 = vld [vmem:[%s2396_s3 + $0x4c] ss:$16 sps:$4 sm:$0xff]  }
  0x35   :  { %953 = vmatprep.subr.bf16.mxu1 %v1727_v8  ;;  %v1748_v8 = vld [vmem:[%s2396_s3 + $0x48] ss:$16 sps:$4 sm:$0xff]  }
  0x37   :  { %466 = vmatpush1.bf16.msra.mxu0 %v1635_v34  ;;  %v1736_v34 = vld [vmem:[%s2396_s3 + $0x1c4] ss:$16 sps:$4 sm:$0xff]  }
  0x38   :  { %467 = vmatprep.subr.bf16.mxu0 %v1636_v36  ;;  %954 = vmatpush1.bf16.msra.mxu1 %v1729_v11  ;;  %v1739_v36 = vld [vmem:[%s2396_s3 + $0x1e4] ss:$16 sps:$4 sm:$0xff]   ;;  %v1756_v11 = vld [vmem:[%s2396_s3 + $0x8c] ss:$16 sps:$4 sm:$0xff]  }
  0x39   :  { %955 = vmatprep.subr.bf16.mxu1 %v1730_v12  ;;  %v1754_v12 = vld [vmem:[%s2396_s3 + $0x88] ss:$16 sps:$4 sm:$0xff]  }
  0x3b   :  { %468 = vmatpush1.bf16.msra.mxu0 %v1638_v38  ;;  %v1744_v38 = vld [vmem:[%s2396_s3 + $0xc] ss:$16 sps:$4 sm:$0xff]  }
  0x3c   :  { %469 = vmatprep.subr.bf16.mxu0 %v1639_v40  ;;  %956 = vmatpush1.bf16.msra.mxu1 %v1732_v15  ;;  %v1791_v40 = vld [vmem:[%s2397_s5] sm:$0xff]   ;;  %v1762_v15 = vld [vmem:[%s2396_s3 + $0xcc] ss:$16 sps:$4 sm:$0xff]  }
  0x3d   :  { %957 = vmatprep.subr.bf16.mxu1 %v1733_v16  ;;  %v1760_v16 = vld [vmem:[%s2396_s3 + $0xc8] ss:$16 sps:$4 sm:$0xff]  }
  0x3f   :  { %470 = vmatpush1.bf16.msra.mxu0 %v1641_v42  ;;  %v1793_v42 = vld [vmem:[%s2397_s5 + $0x8] sm:$0xff]  }
  0x40   :  { %480 = vmatprep.subr.bf16.mxu0 %v1647_v45  ;;  %958 = vmatpush1.bf16.msra.mxu1 %v1735_v19  ;;  %v1796_v45 = vld [vmem:[%s2397_s5 + $0x58] sm:$0xff]  }
  0x41   :  { %959 = vmatprep.subr.bf16.mxu1 %v1736_v34  ;;  %v1768_v19 = vld [vmem:[%s2396_s3 + $0x10c] ss:$16 sps:$4 sm:$0xff]   ;;  %v1787_v34 = vld [vmem:[%s2396_s3 + $0x1e8] ss:$16 sps:$4 sm:$0xff]  }
  0x42   :  { %472 = vmatmul.mubr.bf16.vlgmr.msra.gmra.mrb[0].mxu0 %v1379_v48  ;;  %v1799_v48 = vld [vmem:[%s2397_s5 + $0x20] sm:$0xff]  }
  0x43   :  { %481 = vmatpush1.bf16.msra.mxu0 %v1645_v47  ;;  %512 = vmatprep.mubr.bf16.mxu0 %v1382_v51  ;;  %v1798_v47 = vld [vmem:[%s2397_s5 + $0x60] sm:$0xff]   ;;  %v95_v51 = vlaneseq }
  0x44   :  { %482 = vmatprep.subr.bf16.mxu0 %v1650_v49  ;;  %960 = vmatpush1.bf16.msra.mxu1 %v1738_v35  ;;  %v1800_v49 = vld [vmem:[%s2397_s5 + $0x68] sm:$0xff]   ;;  %v1802_v35 = vld [vmem:[%s2397_s5 + $0x70] sm:$0xff]  }
  0x45   :  { %961 = vmatprep.subr.bf16.mxu1 %v1739_v36  ;;  %v2211_v52 = vshrl.u32 %v95_v51, 7  ;;  %v1803_v36 = vld [vmem:[%s2397_s5 + $0x30] sm:$0xff]  }
  0x46   :  { %v1818_v51 = vld [vmem:[%s2397_s5 + $0xf0] sm:$0xff]  }
  0x47   :  { %483 = vmatpush1.bf16.msra.mxu0 %v1648_v53  ;;  %v97_v53 = vsub.s32 0, %v2211_v52  ;;  %v101_v55 = vsub.s32 1, %v2211_v52 }
  0x48   :  { %484 = vmatprep.subr.bf16.mxu0 %v1653_v54  ;;  %962 = vmatpush1.bf16.msra.mxu1 %v1741_v37  ;;  %v93_v54 = vld [vmem:[%s2398_s2] sm:$0x3]  ;;  %v1804_v37 = vld [vmem:[%s2397_s5 + $0x78] sm:$0xff]  }
  0x49   :  { %972 = vmatprep.subr.bf16.mxu1 %v1744_v38  ;;  %v98_v56 = vrot.slane %v93_v54, %v97_v53  ;;  %v1805_v38 = vld [vmem:[%s2397_s5 + $0x38] sm:$0xff]  }
  0x4b   :  { %485 = vmatpush1.bf16.msra.mxu0 %v1651_v57  ;;  %v102_v57 = vrot.slane %v93_v54, %v101_v55  ;;  %v1819_v54 = vld [vmem:[%s2397_s5 + $0xb0] sm:$0xff]  }
  0x4c   :  { %486 = vmatprep.subr.bf16.mxu0 %v1656_v58 }
  0x4f   :  { %487 = vmatpush1.bf16.msra.mxu0 %v1654_v61 }
  0x50   :  { %488 = vmatprep.subr.bf16.mxu0 %v1659_v62 }
  0x53   :  { %489 = vmatpush1.bf16.msra.mxu0 %v1657_v1 }
  0x54   :  { %490 = vmatprep.subr.bf16.mxu0 %v1662_v2 }
  0x57   :  { %491 = vmatpush1.bf16.msra.mxu0 %v1660_v5  ;;  %v1747_v5 = vld [vmem:[%s2396_s3 + $0x2c] ss:$16 sps:$4 sm:$0xff]  }
  0x58   :  { %492 = vmatprep.subr.bf16.mxu0 %v1665_v6  ;;  %v1745_v6 = vld [vmem:[%s2396_s3 + $0x28] ss:$16 sps:$4 sm:$0xff]  }
  0x5b   :  { %493 = vmatpush1.bf16.msra.mxu0 %v1663_v9  ;;  %v1753_v9 = vld [vmem:[%s2396_s3 + $0x6c] ss:$16 sps:$4 sm:$0xff]  }
  0x5c   :  { %494 = vmatprep.subr.bf16.mxu0 %v1668_v10  ;;  %v1751_v10 = vld [vmem:[%s2396_s3 + $0x68] ss:$16 sps:$4 sm:$0xff]  }
  0x5f   :  { %495 = vmatpush1.bf16.msra.mxu0 %v1666_v13  ;;  %v1759_v13 = vld [vmem:[%s2396_s3 + $0xac] ss:$16 sps:$4 sm:$0xff]  }
  0x60   :  { %496 = vmatprep.subr.bf16.mxu0 %v1671_v14  ;;  %v1757_v14 = vld [vmem:[%s2396_s3 + $0xa8] ss:$16 sps:$4 sm:$0xff]  }
  0x63   :  { %497 = vmatpush1.bf16.msra.mxu0 %v1669_v17  ;;  %v1765_v17 = vld [vmem:[%s2396_s3 + $0xec] ss:$16 sps:$4 sm:$0xff]  }
  0x64   :  { %498 = vmatprep.subr.bf16.mxu0 %v1674_v18  ;;  %v1763_v18 = vld [vmem:[%s2396_s3 + $0xe8] ss:$16 sps:$4 sm:$0xff]  }
  0x67   :  { %499 = vmatpush1.bf16.msra.mxu0 %v1672_v20  ;;  %v1766_v20 = vld [vmem:[%s2396_s3 + $0x108] ss:$16 sps:$4 sm:$0xff]  }
  0x68   :  { %500 = vmatprep.subr.bf16.mxu0 %v1677_v21  ;;  %v1771_v21 = vld [vmem:[%s2396_s3 + $0x12c] ss:$16 sps:$4 sm:$0xff]  }
  0x6b   :  { %501 = vmatpush1.bf16.msra.mxu0 %v1675_v22  ;;  %v1769_v22 = vld [vmem:[%s2396_s3 + $0x128] ss:$16 sps:$4 sm:$0xff]  }
  0x6c   :  { %502 = vmatprep.subr.bf16.mxu0 %v1680_v23  ;;  %v1774_v23 = vld [vmem:[%s2396_s3 + $0x14c] ss:$16 sps:$4 sm:$0xff]  }
  0x6f   :  { %503 = vmatpush1.bf16.msra.mxu0 %v1678_v24  ;;  %v1772_v24 = vld [vmem:[%s2396_s3 + $0x148] ss:$16 sps:$4 sm:$0xff]  }
  0x70   :  { %504 = vmatprep.subr.bf16.mxu0 %v1683_v25  ;;  %v1777_v25 = vld [vmem:[%s2396_s3 + $0x16c] ss:$16 sps:$4 sm:$0xff]  }
  0x73   :  { %505 = vmatpush1.bf16.msra.mxu0 %v1681_v26  ;;  %v1775_v26 = vld [vmem:[%s2396_s3 + $0x168] ss:$16 sps:$4 sm:$0xff]  }
  0x74   :  { %506 = vmatprep.subr.bf16.mxu0 %v1686_v27  ;;  %v1780_v27 = vld [vmem:[%s2396_s3 + $0x18c] ss:$16 sps:$4 sm:$0xff]  }
  0x77   :  { %507 = vmatpush1.bf16.msra.mxu0 %v1684_v28  ;;  %v1778_v28 = vld [vmem:[%s2396_s3 + $0x188] ss:$16 sps:$4 sm:$0xff]  }
  0x78   :  { %508 = vmatprep.subr.bf16.mxu0 %v1689_v29  ;;  %v1783_v29 = vld [vmem:[%s2396_s3 + $0x1ac] ss:$16 sps:$4 sm:$0xff]  }
  0x7b   :  { %509 = vmatpush1.bf16.msra.mxu0 %v1687_v30  ;;  %v1781_v30 = vld [vmem:[%s2396_s3 + $0x1a8] ss:$16 sps:$4 sm:$0xff]  }
  0x7c   :  { %510 = vmatprep.subr.bf16.mxu0 %v1692_v31  ;;  %v1786_v31 = vld [vmem:[%s2396_s3 + $0x1cc] ss:$16 sps:$4 sm:$0xff]  }
  0x7f   :  { %511 = vmatpush1.bf16.msra.mxu0 %v1690_v32  ;;  %v1784_v32 = vld [vmem:[%s2396_s3 + $0x1c8] ss:$16 sps:$4 sm:$0xff]  }
  0x80   :  { %1544 = vmatprep.subr.bf16.mxu0 %v1790_v39  ;;  %v1806_v39 = vld [vmem:[%s2397_s5 + $0xc0] sm:$0xff]  }
  0x82   :  { %513 = vmatmul.mubr.bf16.vlgmr.msra.gmra.mrb[0].mxu0 %v1381_v33  ;;  %v1789_v33 = vld [vmem:[%s2396_s3 + $0x1ec] ss:$16 sps:$4 sm:$0xff]  }
  0x83   :  { %1545 = vmatpush3.bf16.msra.mxu0 %v1791_v40  ;;  %v1807_v40 = vld [vmem:[%s2397_s5 + $0x80] sm:$0xff]  }
  0x84   :  { %1546 = vmatprep.subr.bf16.mxu0 %v1792_v41  ;;  %v1808_v41 = vld [vmem:[%s2397_s5 + $0xc8] sm:$0xff]  }
  0x87   :  { %1547 = vmatpush3.bf16.msra.mxu0 %v1793_v42  ;;  %v1809_v42 = vld [vmem:[%s2397_s5 + $0x88] sm:$0xff]  }
  0x88   :  { %1548 = vmatprep.subr.bf16.mxu0 %v1794_v43  ;;  %v1810_v43 = vld [vmem:[%s2397_s5 + $0xd0] sm:$0xff]  }
  0x8b   :  { %1549 = vmatpush3.bf16.msra.mxu0 %v1795_v44  ;;  %v1811_v44 = vld [vmem:[%s2397_s5 + $0x90] sm:$0xff]  }
  0x8c   :  { %1550 = vmatprep.subr.bf16.mxu0 %v1796_v45  ;;  %v1812_v45 = vld [vmem:[%s2397_s5 + $0xd8] sm:$0xff]  }
  0x8f   :  { %1551 = vmatpush3.bf16.msra.mxu0 %v1797_v46  ;;  %v1813_v46 = vld [vmem:[%s2397_s5 + $0x98] sm:$0xff]  }
  0x90   :  { %1552 = vmatprep.subr.bf16.mxu0 %v1798_v47  ;;  %v1814_v47 = vld [vmem:[%s2397_s5 + $0xe0] sm:$0xff]  }
  0x93   :  { %1553 = vmatpush3.bf16.msra.mxu0 %v1799_v48  ;;  %v1815_v48 = vld [vmem:[%s2397_s5 + $0xa0] sm:$0xff]  }
  0x94   :  { %1554 = vmatprep.subr.bf16.mxu0 %v1800_v49  ;;  %v1816_v49 = vld [vmem:[%s2397_s5 + $0xe8] sm:$0xff]  }
  0x97   :  { %1555 = vmatpush3.bf16.msra.mxu0 %v1801_v50  ;;  %v1817_v50 = vld [vmem:[%s2397_s5 + $0xa8] sm:$0xff]  }
  0x98   :  { %1556 = vmatprep.subr.bf16.mxu0 %v1802_v35 }
  0x9b   :  { %1557 = vmatpush3.bf16.msra.mxu0 %v1803_v36 }
  0x9c   :  { %1558 = vmatprep.subr.bf16.mxu0 %v1804_v37 }
  0x9f   :  { %1559 = vmatpush3.bf16.msra.mxu0 %v1805_v38 }
 0x155   :  { %v514_v58 = vpop.f32.mrb[0].mxu0 }
 0x156   :  { %v1588_v59 = vadd.f32 %v514_v58, %v98_v56  ;;  %v516_v60 = vpop.f32.mrb[1].mxu0  ;;  %v1820_v56 = vld [vmem:[%s2397_s5 + $0xf8] sm:$0xff]   ;;  %v589_v58 = vld [vmem:[%s2399_s4] sm:$0xf] }
 0x157   :  { %v1589_v61 = vadd.f32 %v516_v60, %v102_v57  ;;  %v518_v62 = vpop.f32.mrb[2].mxu0  ;;  %v1821_v57 = vld [vmem:[%s2397_s5 + $0xb8] sm:$0xff]   ;;  %v598_v60 = vrot.slane %v589_v58, %v101_v55 }
 0x158   :  { %v521_v63 = vmax.f32 %v1588_v59, 0.0  ;;  %v519_v0 = vpop.f32.mrb[3].mxu0  ;;  %v594_v59 = vrot.slane %v589_v58, %v97_v53 }
 0x159   :  { %v522_v1 = vmax.f32 %v1589_v61, 0.0 }
 0x15a   :  { %v2225_v4 = vpack.c.bf16 %v521_v63, %v521_v63 }
 0x15b   :  { %v524_v2 = vpack.c.bf16 %v522_v1, %v522_v1 }
 0x15d   :  { %963 = vmatprep.mubr.bf16.mxu1 %v524_v2 }
 0x15e   :  { %964 = vmatmul.mubr.bf16.vlgmr.msra.gmra.mrb[0].mxu1 %v2225_v4 }
 0x15f   :  { %973 = vmatpush1.bf16.msra.mxu1 %v1742_v3  ;;  %1004 = vmatprep.mubr.bf16.mxu1 %v524_v2 }
 0x160   :  { %974 = vmatprep.subr.bf16.mxu1 %v1747_v5 }
 0x163   :  { %975 = vmatpush1.bf16.msra.mxu1 %v1745_v6 }
 0x164   :  { %976 = vmatprep.subr.bf16.mxu1 %v1750_v7  ;;  %v601_v7 = vsub.s32 2, %v2211_v52 }
 0x166   :  { %v602_v53 = vrot.slane %v589_v58, %v601_v7 }
 0x167   :  { %977 = vmatpush1.bf16.msra.mxu1 %v1748_v8  ;;  %v605_v8 = vsub.s32 3, %v2211_v52  ;;  %v1511_v52 = vld [vmem:[%s2400_s6] ss:$0 sm:$0xff] }
 0x168   :  { %978 = vmatprep.subr.bf16.mxu1 %v1753_v9 }
 0x169   :  { %v606_v9 = vrot.slane %v589_v58, %v605_v8 }
 0x16b   :  { %979 = vmatpush1.bf16.msra.mxu1 %v1751_v10 }
 0x16c   :  { %980 = vmatprep.subr.bf16.mxu1 %v1756_v11 }
 0x16f   :  { %981 = vmatpush1.bf16.msra.mxu1 %v1754_v12 }
 0x170   :  { %982 = vmatprep.subr.bf16.mxu1 %v1759_v13 }
 0x173   :  { %983 = vmatpush1.bf16.msra.mxu1 %v1757_v14 }
 0x174   :  { %984 = vmatprep.subr.bf16.mxu1 %v1762_v15 }
 0x177   :  { %985 = vmatpush1.bf16.msra.mxu1 %v1760_v16 }
 0x178   :  { %986 = vmatprep.subr.bf16.mxu1 %v1765_v17 }
 0x17b   :  { %987 = vmatpush1.bf16.msra.mxu1 %v1763_v18 }
 0x17c   :  { %988 = vmatprep.subr.bf16.mxu1 %v1768_v19 }
 0x17f   :  { %989 = vmatpush1.bf16.msra.mxu1 %v1766_v20 }
 0x180   :  { %990 = vmatprep.subr.bf16.mxu1 %v1771_v21 }
 0x183   :  { %991 = vmatpush1.bf16.msra.mxu1 %v1769_v22 }
 0x184   :  { %992 = vmatprep.subr.bf16.mxu1 %v1774_v23 }
 0x187   :  { %993 = vmatpush1.bf16.msra.mxu1 %v1772_v24 }
 0x188   :  { %994 = vmatprep.subr.bf16.mxu1 %v1777_v25 }
 0x18b   :  { %995 = vmatpush1.bf16.msra.mxu1 %v1775_v26 }
 0x18c   :  { %996 = vmatprep.subr.bf16.mxu1 %v1780_v27 }
 0x18f   :  { %997 = vmatpush1.bf16.msra.mxu1 %v1778_v28 }
 0x190   :  { %998 = vmatprep.subr.bf16.mxu1 %v1783_v29 }
 0x193   :  { %999 = vmatpush1.bf16.msra.mxu1 %v1781_v30 }
 0x194   :  { %1000 = vmatprep.subr.bf16.mxu1 %v1786_v31 }
 0x197   :  { %1001 = vmatpush1.bf16.msra.mxu1 %v1784_v32 }
 0x198   :  { %1002 = vmatprep.subr.bf16.mxu1 %v1789_v33 }
 0x19b   :  { %1003 = vmatpush1.bf16.msra.mxu1 %v1787_v34 }
 0x19c   :  { %1566 = vmatprep.subr.bf16.mxu1 %v1806_v39 }
 0x19e   :  { %1005 = vmatmul.mubr.bf16.vlgmr.msra.gmra.mrb[4].mxu1 %v2225_v4 }
 0x19f   :  { %1567 = vmatpush3.bf16.msra.mxu1 %v1807_v40 }
 0x1a0   :  { %1568 = vmatprep.subr.bf16.mxu1 %v1808_v41 }
 0x1a3   :  { %1569 = vmatpush3.bf16.msra.mxu1 %v1809_v42 }
 0x1a4   :  { %1570 = vmatprep.subr.bf16.mxu1 %v1810_v43 }
 0x1a7   :  { %1571 = vmatpush3.bf16.msra.mxu1 %v1811_v44 }
 0x1a8   :  { %1572 = vmatprep.subr.bf16.mxu1 %v1812_v45 }
 0x1ab   :  { %1573 = vmatpush3.bf16.msra.mxu1 %v1813_v46 }
 0x1ac   :  { %1574 = vmatprep.subr.bf16.mxu1 %v1814_v47 }
 0x1af   :  { %1575 = vmatpush3.bf16.msra.mxu1 %v1815_v48 }
 0x1b0   :  { %1576 = vmatprep.subr.bf16.mxu1 %v1816_v49 }
 0x1b3   :  { %1577 = vmatpush3.bf16.msra.mxu1 %v1817_v50 }
 0x1b4   :  { %1578 = vmatprep.subr.bf16.mxu1 %v1818_v51 }
 0x1b7   :  { %1579 = vmatpush3.bf16.msra.mxu1 %v1819_v54 }
 0x1b8   :  { %1580 = vmatprep.subr.bf16.mxu1 %v1820_v56 }
 0x1bb   :  { %1581 = vmatpush3.bf16.msra.mxu1 %v1821_v57 }
 0x231   :  { %v965_v61 = vpop.f32.mrb[0].mxu1 }
 0x232   :  { %v966_v62 = vadd.f32 %v965_v61, %v594_v59  ;;  %v967_v63 = vpop.f32.mrb[1].mxu1 }
 0x233   :  { %v968_v0 = vadd.f32 %v967_v63, %v598_v60  ;;  %v969_v1 = vpop.f32.mrb[2].mxu1 }
 0x234   :  { %v1013_v2 = vmax.f32 %v966_v62, 0.0  ;;  %v970_v3 = vpop.f32.mrb[3].mxu1 }
 0x235   :  { %v1014_v4 = vmax.f32 %v968_v0, 0.0 }
 0x236   :  { %v1017_v6 = vpack.c.bf16 %v1013_v2, %v1013_v2 }
 0x237   :  { %v1018_v5 = vpack.c.bf16 %v1014_v4, %v1014_v4 }
 0x239   :  { %1316 = vmatprep.mubr.bf16.mxu0 %v1018_v5 }
 0x23a   :  { %1317 = vmatmul.mubr.bf16.vlgmr.msra.gmra.mrb[4].mxu0 %v1017_v6 }
 0x271   :  { %v1006_v10 = vpop.f32.mrb[4].mxu1 }
 0x272   :  { %v1007_v55 = vadd.f32 %v1006_v10, %v602_v53  ;;  %v1008_v11 = vpop.f32.mrb[5].mxu1 }
 0x273   :  { %v1009_v12 = vadd.f32 %v1008_v11, %v606_v9  ;;  %v1010_v13 = vpop.f32.mrb[6].mxu1 }
 0x274   :  { %v1015_v14 = vmax.f32 %v1007_v55, 0.0  ;;  %v1011_v15 = vpop.f32.mrb[7].mxu1 }
 0x275   :  { %v1016_v16 = vmax.f32 %v1009_v12, 0.0 }
 0x276   :  { %v1019_v18 = vpack.c.bf16 %v1015_v14, %v1015_v14 }
 0x277   :  { %v1020_v17 = vpack.c.bf16 %v1016_v16, %v1016_v16 }
 0x279   :  { %1356 = vmatprep.mubr.bf16.mxu1 %v1020_v17 }
 0x27a   :  { %1357 = vmatmul.mubr.bf16.vlgmr.msra.gmra.mrb[8].mxu1 %v1019_v18 }
 0x30d   :  { %v1560_v19 = vpop.f32.mrb[4].mxu0 }
 0x30e   :  { %v1561_v20 = vpop.f32.mrb[5].mxu0 }
 0x30f   :  { %v1562_v21 = vadd.f32 %v1561_v20, %v1560_v19  ;;  %v1563_v22 = vpop.f32.mrb[6].mxu0 }
 0x310   :  { %v1564_v23 = vpop.f32.mrb[7].mxu0 }
 0x311   :  { %v1319_v26 = vadd.f32 %v1562_v21, %v1511_v52 }
 0x34d   :  { %v1582_v24 = vpop.f32.mrb[8].mxu1 }
 0x34e   :  { %v1583_v25 = vpop.f32.mrb[9].mxu1 }
 0x34f   :  { %v1584_v27 = vadd.f32 %v1583_v25, %v1582_v24  ;;  %v1585_v28 = vpop.f32.mrb[10].mxu1 }
 0x350   :  { %v1586_v29 = vpop.f32.mrb[11].mxu1 }
 0x351   :  { %v1359_v30 = vadd.f32 %v1584_v27, %v1319_v26 }
 0x353   :  { %1364 = vmax.xlane.f32.xlu0 %v1359_v30 }
 0x3e0   :  { %v1365_v31 = vpop.xlane.xlu0 %1364 }
 0x3e1   :  { %v1366_v32 = vsub.f32 %v1359_v30, %v1365_v31 }
 0x3e3   :  { %v1367_v33 = vmul.f32 1.442695, %v1366_v32 }
 0x3e5   :  { %1822 = vpow2.f32 %v1367_v33 }
 0x3ef   :  { %v1823_v34 = vpop.eup %1822 }
 0x3f0   :  { %1369 = vadd.xlane.f32.xlu0 %v1823_v34 }
 0x47d   :  { %v1370_v35 = vpop.xlane.xlu0 %1369 }
 0x47e   :  { %1824 = vrcp.f32 %v1370_v35 }
 0x488   :  { %v1825_v36 = vpop.eup %1824 }
 0x489   :  { %v1372_v37 = vmul.f32 %v1825_v36, %v1823_v34 }
 0x48b   :  { %v1373_v38 = vpack.c.bf16 %v1372_v37, %v1372_v37 }
 0x48d   :  { %1374 = vst [vmem:[%s2401_s7] sm:$0xf] %v1373_v38 }

</bundles_post_ra>
